<compile_context>
chip_gen: v7x
topology: tpu7x:2x2x1
jax: 0.10.0
libtpu: 0.0.40
codegen_flags: <defaults>
</compile_context>

<pallas_src>
import functools

import numpy as np
import jax
import jax.numpy as jnp
from jax import lax
from jax.experimental import pallas as pl
from jax.experimental.pallas import tpu as pltpu


def _round_up(x: int, m: int) -> int:
    return (x + m - 1) // m * m


def _lse_kernel(gid_col_ref, gid_row_ref, x_ref, o_ref, *, g_pad: int):
    """One grid step = one hidden slab; all groups are reduced in this step.

    gid_col_ref: (N_pad, 1) int32 dense group index per row (-1 for padding rows)
    gid_row_ref: (1, N_pad) int32 same ids, lane-major (for the lane-dense one-hot)
    x_ref:       (N_pad, h_tile)  representations (hidden slab)
    o_ref:       (g_pad, h_tile)  per-group log-sum-exp rows
    """
    n_pad = x_ref.shape[0]
    neg_inf = jnp.float32(-jnp.inf)

    x = x_ref[...].astype(jnp.float32)            # (N_pad, h_tile)
    gid_c = gid_col_ref[...]                      # (N_pad, 1) int32
    gid_r = gid_row_ref[...]                      # (1, N_pad) int32

    # --- per-group, per-column max (exact; one masked max per group) ----------------
    maxes = []
    for g in range(g_pad):
        mask_g = gid_c == g                                                # (N_pad, 1)
        maxes.append(jnp.max(jnp.where(mask_g, x, neg_inf), axis=0, keepdims=True))
    m_all = jnp.concatenate(maxes, axis=0)                                 # (g_pad, h_tile)
    # Empty (padded) groups have max == -inf; replace with 0 so 0 * (-inf) never
    # reaches the MXU (it would be NaN). For such groups s == 0 below, so the
    # output row is -inf and the wrapper slices it away.
    m_fin = jnp.where(m_all == neg_inf, jnp.float32(0.0), m_all)           # (g_pad, h_tile)

    # --- scatter each group's max back to its rows: exact one-hot matmul on the MXU -
    onehot_rows = (gid_c == lax.broadcasted_iota(jnp.int32, (n_pad, g_pad), 1)
                   ).astype(jnp.float32)                                   # (N_pad, g_pad) 0/1
    row_max = lax.dot_general(
        onehot_rows, m_fin,
        dimension_numbers=(((1,), (0,)), ((), ())),
        precision=lax.Precision.HIGHEST,
        preferred_element_type=jnp.float32)                                # (N_pad, h_tile)

    # --- exp exactly once per hidden slab -------------------------------------------
    valid = gid_c >= 0                                                     # (N_pad, 1)
    e = jnp.exp(jnp.where(valid, x - row_max, neg_inf))                    # (N_pad, h_tile)

    # --- grouped sum on the MXU: lane-dense one-hot along N, canonical contraction --
    onehot_groups = (gid_r == lax.broadcasted_iota(jnp.int32, (g_pad, n_pad), 0)
                     ).astype(jnp.float32)                                 # (g_pad, N_pad) 0/1
    s = lax.dot_general(
        onehot_groups, e,
        dimension_numbers=(((1,), (0,)), ((), ())),
        precision=lax.Precision.HIGHEST,
        preferred_element_type=jnp.float32)                                # (g_pad, h_tile)

    # Real groups: s >= 1 -> finite log. Empty/all -inf groups: s == 0 -> -inf row.
    o_ref[...] = (m_fin + jnp.log(s)).astype(o_ref.dtype)


def _vmem_limit_bytes() -> int:
    """Generation-aware VMEM limit: ~75% of physical (48 MiB on 64-MiB v7x,
    96 MiB on 128-MiB v5e/v6e). Conservative 64-MiB fallback if the query fails."""
    cap = 64 * 1024 * 1024
    try:
        info = pltpu.get_tpu_info()
        cap = int(getattr(info, "vmem_capacity_bytes", cap))
    except Exception:
        pass
    return int(min(100 * 1024 * 1024, max(32 * 1024 * 1024, (cap * 3) // 4)))


def _resident_bytes(n_pad: int, g_pad: int, h_tile: int, itemsize: int) -> int:
    """Rough per-grid-step VMEM residency: double-buffered blocks + f32 temporaries."""
    f32 = 4
    # per hidden lane: x double-buffer + (x_f32, e, row_max, masked-max temp)
    #                  + out double-buffer + (m_all, m_fin, s)
    per_h = n_pad * (2 * itemsize + 4 * f32) + g_pad * (2 * itemsize + 3 * f32)
    lanes_g = max(_round_up(g_pad, 128), 128)
    lanes_n = max(_round_up(n_pad, 128), 128)
    fixed = 2 * n_pad * lanes_g * f32                 # the two one-hot matrices
    fixed += 2 * (n_pad * 128 + 8 * lanes_n) * 4      # gid column + row blocks
    return per_h * h_tile + fixed


def _choose_h_tile(n_pad: int, g_pad: int, h_pad0: int, itemsize: int, budget: int) -> int:
    """Balanced hidden tiling: fewest equal-ish 128-multiple tiles that fit the budget."""
    num_tiles = 1
    while True:
        h_tile = _round_up(-(-h_pad0 // num_tiles), 128)
        if h_tile == 128 or _resident_bytes(n_pad, g_pad, h_tile, itemsize) <= budget:
            return h_tile
        num_tiles += 1


def lse_aggregate(seq_rep: jax.Array, pair_ids: jax.Array, *,
                  group_idx: jax.Array | None = None,
                  num_groups: int | None = None,
                  h_tile: int | None = None) -> jax.Array:
    """Pallas implementation of LSEAggregator.forward.

    seq_rep:  [N, H] float
    pair_ids: [N]    int
    returns:  [G, H] float, G = number of unique pair ids (sorted, like torch.unique).

    Pass a precomputed dense `group_idx` ([N] int32 in [0, num_groups)) and
    `num_groups` to make the wrapper jit-able; values outside [0, num_groups)
    are silently ignored (never match any one-hot column).
    """
    if group_idx is None or num_groups is None:
        # TODO(synk): jnp.unique has a data-dependent output shape, so this default
        # path is eager-only (like the PyTorch module); under jit pass group_idx /
        # num_groups (e.g. via jnp.unique(..., size=...)) instead.
        unique_ids = jnp.unique(pair_ids)
        num_groups = int(unique_ids.shape[0])
        group_idx = jnp.searchsorted(unique_ids, pair_ids).astype(jnp.int32)
    else:
        group_idx = group_idx.astype(jnp.int32)

    n, h = seq_rep.shape
    itemsize = jnp.dtype(seq_rep.dtype).itemsize

    # Hardware-friendly padding: rows/groups -> multiple of 8 (sublane), hidden ->
    # multiple of 128 (lane-dense loads/stores), balanced hidden tiles.
    n_pad = _round_up(max(n, 8), 8)
    g_pad = _round_up(max(num_groups, 8), 8)
    h_pad0 = _round_up(h, 128)

    vmem_limit = _vmem_limit_bytes()
    if h_tile is None:
        h_tile = _choose_h_tile(n_pad, g_pad, h_pad0, itemsize, budget=(vmem_limit * 4) // 5)
    else:
        h_tile = _round_up(max(int(h_tile), 128), 128)
    num_h_tiles = -(-h_pad0 // h_tile)
    h_pad = h_tile * num_h_tiles

    x = jnp.zeros((n_pad, h_pad), seq_rep.dtype).at[:n, :h].set(seq_rep)
    gid_col = jnp.full((n_pad, 1), -1, dtype=jnp.int32).at[:n, 0].set(group_idx)
    gid_row = jnp.full((1, n_pad), -1, dtype=jnp.int32).at[0, :n].set(group_idx)

    cost = pl.CostEstimate(
        flops=int(4 * n_pad * g_pad * h_pad),                 # two one-hot matmuls
        transcendentals=int((n_pad + g_pad) * h_pad),         # exp + log
        bytes_accessed=int((n_pad + g_pad) * h_pad * itemsize + 2 * n_pad * 4),
    )

    out = pl.pallas_call(
        functools.partial(_lse_kernel, g_pad=g_pad),
        out_shape=jax.ShapeDtypeStruct((g_pad, h_pad), seq_rep.dtype),
        grid_spec=pltpu.PrefetchScalarGridSpec(
            num_scalar_prefetch=0,
            grid=(num_h_tiles,),   # hidden slabs only; each x slab DMA'd exactly once
            in_specs=[
                pl.BlockSpec((n_pad, 1), lambda jh: (0, 0)),        # gid column (max masks)
                pl.BlockSpec((1, n_pad), lambda jh: (0, 0)),        # gid row (lane-dense one-hot)
                pl.BlockSpec((n_pad, h_tile), lambda jh: (0, jh)),  # representations slab
            ],
            out_specs=pl.BlockSpec((g_pad, h_tile), lambda jh: (0, jh)),
        ),
        compiler_params=pltpu.CompilerParams(
            # Stateless across grid steps -> the single hidden-tile axis is parallel
            # (sharded across v7x's two TensorCores when num_h_tiles > 1; neutral on
            # single-core v5e/v6e).
            dimension_semantics=("parallel",),
            vmem_limit_bytes=int(vmem_limit),
        ),
        cost_estimate=cost,
    )(gid_col, gid_row, x)

    # Padded group rows are -inf; slice them (and the lane padding) away.
    return out[:num_groups, :h]


def _reference(seq_rep: np.ndarray, pair_ids: np.ndarray) -> np.ndarray:
    """Pure-numpy reference mirroring the PyTorch forward."""
    outs = []
    for p in np.unique(pair_ids):                         # sorted, like torch.unique
        rows = seq_rep[pair_ids == p]                     # (k, H)
        mx = rows.max(axis=0, keepdims=True)
        outs.append((mx + np.log(np.exp(rows - mx).sum(axis=0, keepdims=True)))[0])
    return np.stack(outs, axis=0)


if __name__ == "__main__":
    key = jax.random.PRNGKey(0)
    k1, k2, k3, k4 = jax.random.split(key, 4)

    # Case 1: small shapes consistent with the module: N mention rows, hidden H.
    N, H = 8, 32
    seq_rep = jax.random.normal(k1, (N, H), dtype=jnp.float32)
    pair_ids = jnp.array([5, 2, 5, 9, 2, 2, 9, 5], dtype=jnp.int32)   # 3 unique groups
    out = jax.block_until_ready(lse_aggregate(seq_rep, pair_ids))
    ref = _reference(np.asarray(seq_rep), np.asarray(pair_ids))
    np.testing.assert_allclose(np.asarray(out), ref, rtol=1e-5, atol=1e-5)

    # Case 2: more groups than one sublane tile + non-trivial row/lane padding.
    N2, H2 = 21, 48
    seq_rep2 = 3.0 * jax.random.normal(k2, (N2, H2), dtype=jnp.float32)
    pair_ids2 = jax.random.randint(k3, (N2,), 0, 13, dtype=jnp.int32)
    out2 = jax.block_until_ready(lse_aggregate(seq_rep2, pair_ids2))
    ref2 = _reference(np.asarray(seq_rep2), np.asarray(pair_ids2))
    np.testing.assert_allclose(np.asarray(out2), ref2, rtol=1e-5, atol=1e-5)

    # Case 3: force two hidden slabs to exercise the multi-tile grid path.
    N3, H3 = 16, 200
    seq_rep3 = jax.random.normal(k4, (N3, H3), dtype=jnp.float32)
    pair_ids3 = jnp.arange(N3, dtype=jnp.int32) % 5
    out3 = jax.block_until_ready(lse_aggregate(seq_rep3, pair_ids3, h_tile=128))
    ref3 = _reference(np.asarray(seq_rep3), np.asarray(pair_ids3))
    np.testing.assert_allclose(np.asarray(out3), ref3, rtol=1e-5, atol=1e-5)

    print("KERNEL_OK")
</pallas_src>

<mosaic_0001>
module attributes {stable_mosaic.version = 11 : i64} {
  func.func @_lse_kernel(%arg0: i32, %arg1: memref<8x1xi32, #tpu.memory_space<vmem>>, %arg2: memref<1x8xi32, #tpu.memory_space<vmem>>, %arg3: memref<8x128xf32, #tpu.memory_space<vmem>>, %arg4: memref<8x128xf32, #tpu.memory_space<vmem>>) attributes {dimension_semantics = [#tpu.dimension_semantics<parallel>], iteration_bounds = array<i64: 1>, scalar_prefetch = 0 : i64, scratch_operands = 0 : i64, tpu.core_type = #tpu.core_type<tc>, window_params = [{pipeline_mode = #tpu.pipeline_mode<synchronous>, transform_indices = @transform_0, window_bounds = array<i64: 8, 1>}, {pipeline_mode = #tpu.pipeline_mode<synchronous>, transform_indices = @transform_1, window_bounds = array<i64: 1, 8>}, {transform_indices = @transform_2, window_bounds = array<i64: 8, 128>}, {transform_indices = @transform_3, window_bounds = array<i64: 8, 128>}]} {
    %c0 = arith.constant 0 : index
    %c0_0 = arith.constant 0 : index
    %0 = vector.load %arg3[%c0, %c0_0] : memref<8x128xf32, #tpu.memory_space<vmem>>, vector<8x128xf32>
    %c0_1 = arith.constant 0 : index
    %c0_2 = arith.constant 0 : index
    %1 = vector.load %arg1[%c0_1, %c0_2] : memref<8x1xi32, #tpu.memory_space<vmem>>, vector<8x1xi32>
    %c0_3 = arith.constant 0 : index
    %c0_4 = arith.constant 0 : index
    %2 = vector.load %arg2[%c0_3, %c0_4] : memref<1x8xi32, #tpu.memory_space<vmem>>, vector<1x8xi32>
    %c0_i32 = arith.constant 0 : i32
    %3 = vector.broadcast %c0_i32 : i32 to vector<8x1xi32>
    %4 = arith.cmpi eq, %1, %3 : vector<8x1xi32>
    %cst = arith.constant 0xFF800000 : f32
    %5 = vector.shape_cast %4 : vector<8x1xi1> to vector<8x1xi1>
    %6 = vector.broadcast %5 : vector<8x1xi1> to vector<8x128xi1>
    %7 = vector.broadcast %cst : f32 to vector<8x128xf32>
    %8 = arith.select %6, %0, %7 : vector<8x128xi1>, vector<8x128xf32>
    %cst_5 = arith.constant dense<0xFF800000> : vector<128xf32>
    %9 = vector.multi_reduction <maximumf>, %8, %cst_5 [0] : vector<8x128xf32> to vector<128xf32>
    %10 = vector.shape_cast %9 : vector<128xf32> to vector<1x128xf32>
    %c1_i32 = arith.constant 1 : i32
    %11 = vector.broadcast %c1_i32 : i32 to vector<8x1xi32>
    %12 = arith.cmpi eq, %1, %11 : vector<8x1xi32>
    %cst_6 = arith.constant 0xFF800000 : f32
    %13 = vector.shape_cast %12 : vector<8x1xi1> to vector<8x1xi1>
    %14 = vector.broadcast %13 : vector<8x1xi1> to vector<8x128xi1>
    %15 = vector.broadcast %cst_6 : f32 to vector<8x128xf32>
    %16 = arith.select %14, %0, %15 : vector<8x128xi1>, vector<8x128xf32>
    %cst_7 = arith.constant dense<0xFF800000> : vector<128xf32>
    %17 = vector.multi_reduction <maximumf>, %16, %cst_7 [0] : vector<8x128xf32> to vector<128xf32>
    %18 = vector.shape_cast %17 : vector<128xf32> to vector<1x128xf32>
    %c2_i32 = arith.constant 2 : i32
    %19 = vector.broadcast %c2_i32 : i32 to vector<8x1xi32>
    %20 = arith.cmpi eq, %1, %19 : vector<8x1xi32>
    %cst_8 = arith.constant 0xFF800000 : f32
    %21 = vector.shape_cast %20 : vector<8x1xi1> to vector<8x1xi1>
    %22 = vector.broadcast %21 : vector<8x1xi1> to vector<8x128xi1>
    %23 = vector.broadcast %cst_8 : f32 to vector<8x128xf32>
    %24 = arith.select %22, %0, %23 : vector<8x128xi1>, vector<8x128xf32>
    %cst_9 = arith.constant dense<0xFF800000> : vector<128xf32>
    %25 = vector.multi_reduction <maximumf>, %24, %cst_9 [0] : vector<8x128xf32> to vector<128xf32>
    %26 = vector.shape_cast %25 : vector<128xf32> to vector<1x128xf32>
    %c3_i32 = arith.constant 3 : i32
    %27 = vector.broadcast %c3_i32 : i32 to vector<8x1xi32>
    %28 = arith.cmpi eq, %1, %27 : vector<8x1xi32>
    %cst_10 = arith.constant 0xFF800000 : f32
    %29 = vector.shape_cast %28 : vector<8x1xi1> to vector<8x1xi1>
    %30 = vector.broadcast %29 : vector<8x1xi1> to vector<8x128xi1>
    %31 = vector.broadcast %cst_10 : f32 to vector<8x128xf32>
    %32 = arith.select %30, %0, %31 : vector<8x128xi1>, vector<8x128xf32>
    %cst_11 = arith.constant dense<0xFF800000> : vector<128xf32>
    %33 = vector.multi_reduction <maximumf>, %32, %cst_11 [0] : vector<8x128xf32> to vector<128xf32>
    %34 = vector.shape_cast %33 : vector<128xf32> to vector<1x128xf32>
    %c4_i32 = arith.constant 4 : i32
    %35 = vector.broadcast %c4_i32 : i32 to vector<8x1xi32>
    %36 = arith.cmpi eq, %1, %35 : vector<8x1xi32>
    %cst_12 = arith.constant 0xFF800000 : f32
    %37 = vector.shape_cast %36 : vector<8x1xi1> to vector<8x1xi1>
    %38 = vector.broadcast %37 : vector<8x1xi1> to vector<8x128xi1>
    %39 = vector.broadcast %cst_12 : f32 to vector<8x128xf32>
    %40 = arith.select %38, %0, %39 : vector<8x128xi1>, vector<8x128xf32>
    %cst_13 = arith.constant dense<0xFF800000> : vector<128xf32>
    %41 = vector.multi_reduction <maximumf>, %40, %cst_13 [0] : vector<8x128xf32> to vector<128xf32>
    %42 = vector.shape_cast %41 : vector<128xf32> to vector<1x128xf32>
    %c5_i32 = arith.constant 5 : i32
    %43 = vector.broadcast %c5_i32 : i32 to vector<8x1xi32>
    %44 = arith.cmpi eq, %1, %43 : vector<8x1xi32>
    %cst_14 = arith.constant 0xFF800000 : f32
    %45 = vector.shape_cast %44 : vector<8x1xi1> to vector<8x1xi1>
    %46 = vector.broadcast %45 : vector<8x1xi1> to vector<8x128xi1>
    %47 = vector.broadcast %cst_14 : f32 to vector<8x128xf32>
    %48 = arith.select %46, %0, %47 : vector<8x128xi1>, vector<8x128xf32>
    %cst_15 = arith.constant dense<0xFF800000> : vector<128xf32>
    %49 = vector.multi_reduction <maximumf>, %48, %cst_15 [0] : vector<8x128xf32> to vector<128xf32>
    %50 = vector.shape_cast %49 : vector<128xf32> to vector<1x128xf32>
    %c6_i32 = arith.constant 6 : i32
    %51 = vector.broadcast %c6_i32 : i32 to vector<8x1xi32>
    %52 = arith.cmpi eq, %1, %51 : vector<8x1xi32>
    %cst_16 = arith.constant 0xFF800000 : f32
    %53 = vector.shape_cast %52 : vector<8x1xi1> to vector<8x1xi1>
    %54 = vector.broadcast %53 : vector<8x1xi1> to vector<8x128xi1>
    %55 = vector.broadcast %cst_16 : f32 to vector<8x128xf32>
    %56 = arith.select %54, %0, %55 : vector<8x128xi1>, vector<8x128xf32>
    %cst_17 = arith.constant dense<0xFF800000> : vector<128xf32>
    %57 = vector.multi_reduction <maximumf>, %56, %cst_17 [0] : vector<8x128xf32> to vector<128xf32>
    %58 = vector.shape_cast %57 : vector<128xf32> to vector<1x128xf32>
    %c7_i32 = arith.constant 7 : i32
    %59 = vector.broadcast %c7_i32 : i32 to vector<8x1xi32>
    %60 = arith.cmpi eq, %1, %59 : vector<8x1xi32>
    %cst_18 = arith.constant 0xFF800000 : f32
    %61 = vector.shape_cast %60 : vector<8x1xi1> to vector<8x1xi1>
    %62 = vector.broadcast %61 : vector<8x1xi1> to vector<8x128xi1>
    %63 = vector.broadcast %cst_18 : f32 to vector<8x128xf32>
    %64 = arith.select %62, %0, %63 : vector<8x128xi1>, vector<8x128xf32>
    %cst_19 = arith.constant dense<0xFF800000> : vector<128xf32>
    %65 = vector.multi_reduction <maximumf>, %64, %cst_19 [0] : vector<8x128xf32> to vector<128xf32>
    %66 = vector.shape_cast %65 : vector<128xf32> to vector<1x128xf32>
    %67 = tpu.concatenate %10, %18, %26, %34, %42, %50, %58, %66 in 0 : vector<1x128xf32>, vector<1x128xf32>, vector<1x128xf32>, vector<1x128xf32>, vector<1x128xf32>, vector<1x128xf32>, vector<1x128xf32>, vector<1x128xf32> -> vector<8x128xf32>
    %cst_20 = arith.constant 0xFF800000 : f32
    %68 = vector.broadcast %cst_20 : f32 to vector<8x128xf32>
    %69 = arith.cmpf oeq, %67, %68 : vector<8x128xf32>
    %cst_21 = arith.constant 0.000000e+00 : f32
    %70 = vector.broadcast %cst_21 : f32 to vector<8x128xf32>
    %71 = arith.select %69, %70, %67 : vector<8x128xi1>, vector<8x128xf32>
    %72 = tpu.iota {dimensions = array<i32: 1>} : vector<8x8xi32>
    %73 = vector.broadcast %1 : vector<8x1xi32> to vector<8x8xi32>
    %74 = arith.cmpi eq, %73, %72 : vector<8x8xi32>
    %75 = arith.extui %74 : vector<8x8xi1> to vector<8x8xi32>
    %76 = arith.sitofp %75 : vector<8x8xi32> to vector<8x8xf32>
    %cst_22 = arith.constant dense<0.000000e+00> : vector<8x128xf32>
    %77 = tpu.matmul %76, %71, %cst_22 {dimension_numbers = #tpu.dot_dimension_numbers<[1], [0], [0], [1], [0, 0, 1, 1], [], []>, precision = #tpu.contract_precision<fp32>} : vector<8x8xf32>, vector<8x128xf32>, vector<8x128xf32> -> vector<8x128xf32>
    %c0_i32_23 = arith.constant 0 : i32
    %78 = vector.broadcast %c0_i32_23 : i32 to vector<8x1xi32>
    %79 = arith.cmpi sge, %1, %78 : vector<8x1xi32>
    %80 = arith.subf %0, %77 : vector<8x128xf32>
    %cst_24 = arith.constant 0xFF800000 : f32
    %81 = vector.shape_cast %79 : vector<8x1xi1> to vector<8x1xi1>
    %82 = vector.broadcast %81 : vector<8x1xi1> to vector<8x128xi1>
    %83 = vector.broadcast %cst_24 : f32 to vector<8x128xf32>
    %84 = arith.select %82, %80, %83 : vector<8x128xi1>, vector<8x128xf32>
    %85 = math.exp %84 : vector<8x128xf32>
    %86 = tpu.iota {dimensions = array<i32: 0>} : vector<8x8xi32>
    %87 = vector.broadcast %2 : vector<1x8xi32> to vector<8x8xi32>
    %88 = arith.cmpi eq, %87, %86 : vector<8x8xi32>
    %89 = arith.extui %88 : vector<8x8xi1> to vector<8x8xi32>
    %90 = arith.sitofp %89 : vector<8x8xi32> to vector<8x8xf32>
    %cst_25 = arith.constant dense<0.000000e+00> : vector<8x128xf32>
    %91 = tpu.matmul %90, %85, %cst_25 {dimension_numbers = #tpu.dot_dimension_numbers<[1], [0], [0], [1], [0, 0, 1, 1], [], []>, precision = #tpu.contract_precision<fp32>} : vector<8x8xf32>, vector<8x128xf32>, vector<8x128xf32> -> vector<8x128xf32>
    %92 = math.log %91 : vector<8x128xf32>
    %93 = arith.addf %71, %92 : vector<8x128xf32>
    %c0_26 = arith.constant 0 : index
    %c0_27 = arith.constant 0 : index
    %94 = vector.load %arg4[%c0_26, %c0_27] : memref<8x128xf32, #tpu.memory_space<vmem>>, vector<8x128xf32>
    tpu.vector_store %arg4[%c0_26, %c0_27], %93 {strides = array<i32>} : memref<8x128xf32, #tpu.memory_space<vmem>>, vector<8x128xf32>,
    return
  }
  func.func @transform_0(%arg0: i32) -> (i32, i32) {
    %c0_i32 = arith.constant 0 : i32
    %c0_i32_0 = arith.constant 0 : i32
    %c0_i32_1 = arith.constant 0 : i32
    return %c0_i32, %c0_i32_0 : i32, i32
  }
  func.func @transform_1(%arg0: i32) -> (i32, i32) {
    %c0_i32 = arith.constant 0 : i32
    %c0_i32_0 = arith.constant 0 : i32
    %c0_i32_1 = arith.constant 0 : i32
    return %c0_i32, %c0_i32_0 : i32, i32
  }
  func.func @transform_2(%arg0: i32) -> (i32, i32) {
    %c0_i32 = arith.constant 0 : i32
    %c0_i32_0 = arith.constant 0 : i32
    return %c0_i32, %arg0 : i32, i32
  }
  func.func @transform_3(%arg0: i32) -> (i32, i32) {
    %c0_i32 = arith.constant 0 : i32
    %c0_i32_0 = arith.constant 0 : i32
    return %c0_i32, %arg0 : i32, i32
  }
}

</mosaic_0001>

<bundles_post_ra>
// kernel: tpu_custom_call.1
= control target key start
LH: loop header
LB: loop body
LE: loop exit
PB: predicated region body
PF: predicated region fallthrough
CT: control target
= control target key end

     0   :  { %s1340_s0 = inlined_call_operand.vmem [shape: s32[8,1], index: 0, kind: input, shape index: {}]   ;;  %s1341_s1 = inlined_call_operand.vmem [shape: s32[1,8], index: 1, kind: input, shape index: {}]   ;;  %s1342_s2 = inlined_call_operand.vmem [shape: f32[8,128], index: 2, kind: input, shape index: {}]   ;;  %s1343_s3 = inlined_call_operand.hbm [shape: f32[8,128], index: 3, kind: output, shape index: {}]  }
   0x1   :  { %v16_v0 = vld [vmem:[%s1340_s0] sm:$0xff] }
   0x2   :  { %8 = vsyncpa [#allocation3], 0  ;;  %v1229_v1 = vmov 0   ;;  %vm44_vm0 = vcmp.eq.s32.totalorder %v16_v0, 2  ;;  %vm18_vm1 = vcmp.eq.s32.totalorder %v16_v0, 0  ;;  %vm57_vm2 = vcmp.eq.s32.totalorder %v16_v0, 3 }
   0x3   :  { %1200 = vset.pattern.permute.xlu1 %v1229_v1  ;;  %1199 = vset.pattern.permute.xlu0 %v1229_v1  ;;  %vm31_vm3 = vcmp.eq.s32.totalorder %v16_v0, 1  ;;  %v45_v2 = vsel %vm44_vm0, 1, %v1229_v1  ;;  %v19_v3 = vsel %vm18_vm1, 1, %v1229_v1  ;;  %v58_v4 = vsel %vm57_vm2, 1, %v1229_v1  ;;  %v1265_v12 = vld [vmem:[%s1342_s2] sm:$0xff] }
   0x4   :  { %47 = vperm.xlu1 %1200, %v45_v2   ;;  %21 = vperm.xlu0 %1199, %v19_v3   ;;  %v32_v5 = vsel %vm31_vm3, 1, %v1229_v1  ;;  %vm83_vm4 = vcmp.eq.s32.totalorder %v16_v0, 5  ;;  %vm70_vm5 = vcmp.eq.s32.totalorder %v16_v0, 4  ;;  %vm109_vm6 = vcmp.eq.s32.totalorder %v16_v0, 7 }
   0x5   :  { %v84_v6 = vsel %vm83_vm4, 1, %v1229_v1  ;;  %v71_v7 = vsel %vm70_vm5, 1, %v1229_v1  ;;  %vm96_vm7 = vcmp.eq.s32.totalorder %v16_v0, 6  ;;  %v110_v8 = vsel %vm109_vm6, 1, %v1229_v1 }
   0x6   :  { %v97_v9 = vsel %vm96_vm7, 1, %v1229_v1  ;;  %vm596_vm8 = vcmp.ge.s32.totalorder %v16_v0, 0  ;;  %v1230_v11 = vmov 0.0   ;;  %vm1231_vm9 = vmmov 0  }
   0x7   :  { %v598_v10 = vsel %vm596_vm8, 1, %v1229_v1  ;;  %1115 = vmatprep.subr.mxu0 %v1230_v11  ;;  %1145 = vmatprep.subr.mxu1 %v1230_v11  ;;  %v138_v31 = vlaneseq  ;;  %vm122_vm0 = vcmask 1040384   ;;  %vm124_vm1 = vcmask 1041408  }
   0x8   :  { %60 = vperm.xlu1 %1200, %v58_v4   ;;  %34 = vperm.xlu0 %1199, %v32_v5   ;;  %vm146_vm2 = vcmask 64512   ;;  %vm126_vm6 = vcmask 1042432   ;;  %vm128_vm7 = vcmask 1043456   ;;  %vm130_vm8 = vcmask 1044480  }
   0x9   :  { %1117 = vmatprep.mubr.msk.f32.mxu0 %vm1231_vm9, %v1230_v11  ;;  %1147 = vmatprep.mubr.msk.f32.mxu1 %vm1231_vm9, %v1230_v11  ;;  %v139_v43 = vand.u32 127, %v138_v31 }
   0xc   :  { %86 = vperm.xlu1 %1200, %v84_v6   ;;  %73 = vperm.xlu0 %1199, %v71_v7  }
  0x10   :  { %112 = vperm.xlu1 %1200, %v110_v8   ;;  %99 = vperm.xlu0 %1199, %v97_v9  }
  0x14   :  { %600 = vperm.xlu1 %1200, %v598_v10   ;;  %141 = vperm.xlu0 %1199, %v16_v0  }
  0x83   :  { %v48_v13 = vpop.permute.xlu1 %47  ;;  %v22_v14 = vpop.permute.xlu0 %21 }
  0x84   :  { %vm49_vm10 = vcmp.eq.s32.totalorder %v48_v13, 1  ;;  %vm23_vm11 = vcmp.eq.s32.totalorder %v22_v14, 1 }
  0x85   :  { %v50_v15 = vsel %vm49_vm10, %v1265_v12, -inf  ;;  %v24_v16 = vsel %vm23_vm11, %v1265_v12, -inf  ;;  %vm132_vm10 = vcmask 1045504   ;;  %vm134_vm11 = vcmask 1046528  }
  0x86   :  { %v51_v17 = vrot.slane %v50_v15, 4  ;;  %v25_v18 = vrot.slane %v24_v16, 4 }
  0x87   :  { %v61_v19 = vpop.permute.xlu1 %60  ;;  %v35_v20 = vpop.permute.xlu0 %34 }
  0x88   :  { %v52_v21 = vmax.f32 %v50_v15, %v51_v17  ;;  %v26_v22 = vmax.f32 %v24_v16, %v25_v18  ;;  %vm62_vm12 = vcmp.eq.s32.totalorder %v61_v19, 1  ;;  %vm36_vm13 = vcmp.eq.s32.totalorder %v35_v20, 1 }
  0x89   :  { %v63_v23 = vsel %vm62_vm12, %v1265_v12, -inf  ;;  %v37_v24 = vsel %vm36_vm13, %v1265_v12, -inf }
  0x8a   :  { %v53_v25 = vrot.slane %v52_v21, 2  ;;  %v27_v26 = vrot.slane %v26_v22, 2  ;;  %v64_v27 = vrot.slane %v63_v23, 4  ;;  %v38_v28 = vrot.slane %v37_v24, 4 }
  0x8b   :  { %v87_v29 = vpop.permute.xlu1 %86  ;;  %v74_v30 = vpop.permute.xlu0 %73 }
  0x8c   :  { %v54_v32 = vmax.f32 %v52_v21, %v53_v25  ;;  %v28_v33 = vmax.f32 %v26_v22, %v27_v26  ;;  %v65_v34 = vmax.f32 %v63_v23, %v64_v27  ;;  %v39_v35 = vmax.f32 %v37_v24, %v38_v28 }
  0x8d   :  { %vm88_vm14 = vcmp.eq.s32.totalorder %v87_v29, 1  ;;  %vm75_vm15 = vcmp.eq.s32.totalorder %v74_v30, 1 }
  0x8e   :  { %v55_v36 = vrot.slane %v54_v32, 1  ;;  %v66_v37 = vrot.slane %v65_v34, 2  ;;  %v40_v38 = vrot.slane %v39_v35, 2  ;;  %v89_v39 = vsel %vm88_vm14, %v1265_v12, -inf }
  0x8f   :  { %v76_v40 = vsel %vm75_vm15, %v1265_v12, -inf  ;;  %v113_v41 = vpop.permute.xlu1 %112  ;;  %v100_v42 = vpop.permute.xlu0 %99  ;;  %v29_v44 = vrot.slane %v28_v33, 1  ;;  %v90_v47 = vrot.slane %v89_v39, 4 }
  0x90   :  { %v67_v45 = vmax.f32 %v65_v34, %v66_v37  ;;  %v41_v46 = vmax.f32 %v39_v35, %v40_v38  ;;  %v77_v48 = vrot.slane %v76_v40, 4  ;;  %vm114_vm3 = vcmp.eq.s32.totalorder %v113_v41, 1 }
  0x91   :  { %vm101_vm4 = vcmp.eq.s32.totalorder %v100_v42, 1  ;;  %v56_v49 = vmax.f32 %v54_v32, %v55_v36  ;;  %v115_v51 = vsel %vm114_vm3, %v1265_v12, -inf  ;;  %v91_v53 = vmax.f32 %v89_v39, %v90_v47  ;;  %v1086_v39 = vld [vmem:[%s1341_s1] ss:$0 sm:$0xff]  ;;  %s1232_s1 = smov [#allocation2]  }
  0x92   :  { %v42_v50 = vrot.slane %v41_v46, 1  ;;  %v102_v52 = vsel %vm101_vm4, %v1265_v12, -inf  ;;  %v78_v54 = vmax.f32 %v76_v40, %v77_v48  ;;  %v116_v55 = vrot.slane %v115_v51, 4  ;;  %s1074_s16 = sshll.u32 %s1232_s1, 4  ;;  %s1075_s16 = int_to_ptr.vmem [resolvable:$true] %s1074_s16 }
  0x93   :  { %v103_v56 = vrot.slane %v102_v52, 4  ;;  %v142_v57 = vpop.permute.xlu0 %141  ;;  %v30_v58 = vmax.f32 %v28_v33, %v29_v44  ;;  %v68_v59 = vrot.slane %v67_v45, 1  ;;  %v92_v61 = vrot.slane %v91_v53, 2  ;;  %v601_v41 = vpop.permute.xlu1 %600  ;;  %s1205_s17 = scalar_lea.vmem %s1075_s16, 128  ;;  %p1210_p1 = scmp.lt.s32.totalorder %s1075_s16, %s1075_s16 }
  0x94   :  { %v43_v60 = vmax.f32 %v41_v46, %v42_v50  ;;  %vm143_vm5 = vcmp.eq.s32.totalorder %v142_v57, %v139_v43  ;;  %v79_v62 = vrot.slane %v78_v54, 2  ;;  %v117_v63 = vmax.f32 %v115_v51, %v116_v55  ;;  %p1206_p0 = scmp.ne.s32.totalorder %s1075_s16, %s1205_s17  ;;  %p1211_p2 = scmp.lt.s32.totalorder %s1205_s17, %s1205_s17 }
  0x95   :  { %v104_v0 = vmax.f32 %v102_v52, %v103_v56  ;;  %v1082_v2 = vsel %vm143_vm5, 1.0, %v1230_v11  ;;  %v93_v4 = vmax.f32 %v91_v53, %v92_v61  ;;  %v69_v7 = vmax.f32 %v67_v45, %v68_v59 }
  0x96   :  { %v123_v1 = vsel %vm122_vm0, %v30_v58, %v43_v60  ;;  %v80_v5 = vmax.f32 %v78_v54, %v79_v62  ;;  %v118_v6 = vrot.slane %v117_v63, 2  ;;  %v148_v9 = vsel %vm146_vm2, %v1082_v2, 0  ;;  %p1212_p3 = por %p1211_p2, %p1210_p1 }
  0x97   :  { %v125_v3 = vsel %vm124_vm1, %v123_v1, %v56_v49  ;;  %v105_v8 = vrot.slane %v104_v0, 2  ;;  %v94_v10 = vrot.slane %v93_v4, 1  ;;  %v217_v15 = vsub.f32 %v148_v9, %v148_v9 }
  0x98   :  { %v81_v13 = vrot.slane %v80_v5, 1  ;;  %v119_v14 = vmax.f32 %v117_v63, %v118_v6  ;;  %v127_v16 = vsel %vm126_vm6, %v125_v3, %v69_v7  ;;  %v607_v38 = vshrl.u32 %v138_v31, 7  ;;  %p1213_p4 = pnand %p1212_p3, %p1206_p0 }
  0x99   :  { %v106_v17 = vmax.f32 %v104_v0, %v105_v8  ;;  %v95_v18 = vmax.f32 %v93_v4, %v94_v10  ;;  %v218_v24 = vand.u32 4294901760, %v217_v15  ;;  %vm602_vm14 = vcmp.eq.s32.totalorder %v601_v41, 1 }
  0x9a   :  { %v82_v19 = vmax.f32 %v80_v5, %v81_v13  ;;  %v120_v20 = vrot.slane %v119_v14, 1  ;;  %vm612_vm13 = vcmp.eq.s32.totalorder %v1086_v39, %v607_v38 }
  0x9b   :  { %v107_v21 = vrot.slane %v106_v17, 1  ;;  %v219_v29 = vsub.f32 %v217_v15, %v218_v24  ;;  %v1087_v40 = vsel %vm612_vm13, 1.0, %v1230_v11 }
  0x9c   :  { %v129_v22 = vsel %vm128_vm7, %v127_v16, %v82_v19  ;;  %v121_v23 = vmax.f32 %v119_v14, %v120_v20  ;;  %v616_v45 = vsel %vm146_vm2, %v1087_v40, 0 }
  0x9d   :  { %v108_v25 = vmax.f32 %v106_v17, %v107_v21  ;;  %v131_v26 = vsel %vm130_vm8, %v129_v22, %v95_v18  ;;  %v220_v33 = vand.u32 4294901760, %v219_v29  ;;  %v685_v48 = vsub.f32 %v616_v45, %v616_v45 }
  0x9f   :  { %v133_v27 = vsel %vm132_vm10, %v131_v26, %v108_v25  ;;  %v686_v31 = vand.u32 4294901760, %v685_v48 }
  0xa0   :  { %v135_v28 = vsel %vm134_vm11, %v133_v27, %v121_v23 }
  0xa1   :  { %vm136_vm12 = vcmp.eq.f32.partialorder %v135_v28, -inf  ;;  %v687_v49 = vsub.f32 %v685_v48, %v686_v31 }
  0xa2   :  { %v1280_v30 = vsel %vm136_vm12, 0.0, %v135_v28 }
  0xa3   :  { %v151_v32 = vand.u32 4294901760, %v1280_v30  ;;  %v688_v51 = vand.u32 4294901760, %v687_v49 }
  0xa5   :  { %1116 = vmatpush3.msra.mxu0 %v151_v32  ;;  %v228_v34 = vsub.f32 %v1280_v30, %v151_v32 }
  0xa6   :  { %1118 = vmatmul.mubr.f32.vlgmr.msra.gmra.mrb[0].mxu0 %v220_v33  ;;  %1120 = vmatprep.subr.mxu0 %v1230_v11 }
  0xa7   :  { %v229_v35 = vand.u32 4294901760, %v228_v34  ;;  %1122 = vmatprep.mubr.msk.f32.mxu0 %vm1231_vm9, %v1230_v11 }
  0xa9   :  { %v230_v36 = vsub.f32 %v228_v34, %v229_v35 }
  0xab   :  { %v231_v37 = vand.u32 4294901760, %v230_v36 }
  0xad   :  { %1121 = vmatpush3.msra.mxu0 %v231_v37 }
  0xae   :  { %1123 = vmatmul.mubr.msk.f32.vlgmr.msra.gmra.mrb[0].mxu0 %vm146_vm2, %v1082_v2  ;;  %1125 = vmatprep.subr.mxu0 %v1230_v11 }
  0xaf   :  { %1126 = vmatpush3.msra.mxu0 %v228_v34  ;;  %1127 = vmatprep.mubr.msk.f32.mxu0 %vm1231_vm9, %v1230_v11 }
  0xb0   :  { %1130 = vmatprep.subr.mxu0 %v1230_v11 }
  0xb6   :  { %1128 = vmatmul.mubr.f32.vlgmr.msra.gmra.mrb[0].mxu0 %v217_v15 }
  0xb7   :  { %1131 = vmatpush3.msra.mxu0 %v151_v32  ;;  %1132 = vmatprep.mubr.msk.f32.mxu0 %vm1231_vm9, %v1230_v11 }
  0xb8   :  { %1135 = vmatprep.subr.mxu0 %v1230_v11 }
  0xbe   :  { %1133 = vmatmul.mubr.f32.vlgmr.msra.gmra.mrb[0].mxu0 %v218_v24 }
  0xbf   :  { %1136 = vmatpush3.msra.mxu0 %v229_v35  ;;  %1137 = vmatprep.mubr.msk.f32.mxu0 %vm1231_vm9, %v1230_v11 }
  0xc0   :  { %1140 = vmatprep.subr.mxu0 %v1230_v11 }
  0xc6   :  { %1138 = vmatmul.mubr.msk.f32.vlgmr.msra.gmra.mrb[0].mxu0 %vm146_vm2, %v1082_v2 }
  0xc7   :  { %1141 = vmatpush3.msra.mxu0 %v151_v32  ;;  %1142 = vmatprep.mubr.msk.f32.mxu0 %vm1231_vm9, %v1230_v11 }
  0xce   :  { %1143 = vmatmul.mubr.msk.f32.vlgmr.msra.gmra.mrb[0].mxu0 %vm146_vm2, %v1082_v2 }
 0x1a1   :  { %v592_v42 = vpop.f32.mrb[0].mxu0 }
 0x1a2   :  { %v597_v43 = vsub.f32 %v1265_v12, %v592_v42  ;;  %v1144_v44 = vpop.f32.mrb[1].mxu0 }
 0x1a4   :  { %v603_v46 = vsel %vm602_vm14, %v597_v43, -inf }
 0x1a5   :  { %v604_v47 = vmul.f32 1.442695, %v603_v46 }
 0x1a7   :  { %1201 = vpow2.f32 %v604_v47 }
 0x1b1   :  { %v1202_v50 = vpop.eup %1201 }
 0x1b2   :  { %v619_v52 = vand.u32 4294901760, %v1202_v50 }
 0x1b4   :  { %1146 = vmatpush3.msra.mxu1 %v619_v52  ;;  %v696_v53 = vsub.f32 %v1202_v50, %v619_v52 }
 0x1b5   :  { %1148 = vmatmul.mubr.f32.vlgmr.msra.gmra.mrb[0].mxu1 %v688_v51  ;;  %1150 = vmatprep.subr.mxu1 %v1230_v11 }
 0x1b6   :  { %v697_v54 = vand.u32 4294901760, %v696_v53  ;;  %1152 = vmatprep.mubr.msk.f32.mxu1 %vm1231_vm9, %v1230_v11 }
 0x1b8   :  { %v698_v12 = vsub.f32 %v696_v53, %v697_v54 }
 0x1ba   :  { %v699_v55 = vand.u32 4294901760, %v698_v12 }
 0x1bc   :  { %1151 = vmatpush3.msra.mxu1 %v699_v55 }
 0x1bd   :  { %1153 = vmatmul.mubr.msk.f32.vlgmr.msra.gmra.mrb[0].mxu1 %vm146_vm2, %v1087_v40  ;;  %1155 = vmatprep.subr.mxu1 %v1230_v11 }
 0x1be   :  { %1156 = vmatpush3.msra.mxu1 %v696_v53  ;;  %1157 = vmatprep.mubr.msk.f32.mxu1 %vm1231_vm9, %v1230_v11 }
 0x1bf   :  { %1160 = vmatprep.subr.mxu1 %v1230_v11 }
 0x1c5   :  { %1158 = vmatmul.mubr.f32.vlgmr.msra.gmra.mrb[0].mxu1 %v685_v48 }
 0x1c6   :  { %1161 = vmatpush3.msra.mxu1 %v619_v52  ;;  %1162 = vmatprep.mubr.msk.f32.mxu1 %vm1231_vm9, %v1230_v11 }
 0x1c7   :  { %1165 = vmatprep.subr.mxu1 %v1230_v11 }
 0x1cd   :  { %1163 = vmatmul.mubr.f32.vlgmr.msra.gmra.mrb[0].mxu1 %v686_v31 }
 0x1ce   :  { %1166 = vmatpush3.msra.mxu1 %v697_v54  ;;  %1167 = vmatprep.mubr.msk.f32.mxu1 %vm1231_vm9, %v1230_v11 }
 0x1cf   :  { %1170 = vmatprep.subr.mxu1 %v1230_v11 }
 0x1d5   :  { %1168 = vmatmul.mubr.msk.f32.vlgmr.msra.gmra.mrb[0].mxu1 %vm146_vm2, %v1087_v40 }
 0x1d6   :  { %1171 = vmatpush3.msra.mxu1 %v619_v52  ;;  %1172 = vmatprep.mubr.msk.f32.mxu1 %vm1231_vm9, %v1230_v11 }
 0x1dd   :  { %1173 = vmatmul.mubr.msk.f32.vlgmr.msra.gmra.mrb[0].mxu1 %vm146_vm2, %v1087_v40 }
 0x2b0   :  { %v1060_v56 = vpop.f32.mrb[0].mxu1 }
 0x2b1   :  { %1203 = vlog2.f32 %v1060_v56  ;;  %v1174_v57 = vpop.f32.mrb[1].mxu1 }
 0x2bb   :  { %v1204_v58 = vpop.eup %1203 }
 0x2bc   :  { %v1065_v59 = vmul.f32 0.6931472, %v1204_v58 }
 0x2be   :  { %v1066_v60 = vadd.f32 %v1065_v59, %v1280_v30 }
 0x2c0   :  { %1067 = vst [vmem:[#allocation2] sm:$0xff] %v1066_v60 }
 0x2c1   :  { %1216 = shalt.err (!%p1213_p4)
}
 0x2c2   :  { %s1217_s20 = scalar_lea.hbm %s1343_s3, 128 }
 0x2c3   :  { %p1218_p5 = scmp.ne.s32.totalorder %s1343_s3, %s1217_s20  ;;  %p1221_p6 = scmp.lt.u32.totalorder %s1217_s20, %s1343_s3 }
 0x2c5   :  { %p1223_p7 = pnand %p1221_p6, %p1218_p5 }
 0x2c7   :  { %1226 = shalt.err (!%p1223_p7)
}
 0x2c8   :  { %1077 = dma.vmem_to_hbm [thread:$0]  %s1075_s16, 128, %s1343_s3, [#allocation3]  }
 0x2c9   :  { %1227 = dma.done.wait [#allocation3], 128  }
 0x2ca   :  { %1228 = vsyncadd [#allocation3], 4294967168 }
 0x2cb   :  { %1081 = vsyncpa [#allocation3], 1 }

</bundles_post_ra>
